<compile_context>
chip_gen: v6e
topology: v6e:2x2x1
jax: 0.10.0
libtpu: 0.0.40
codegen_flags: <defaults>
</compile_context>

<pallas_src>
import jax
import jax.numpy as jnp
from jax.experimental import pallas as pl
from jax.experimental.pallas import tpu as pltpu


# ----------------------------------------------------------------------------
# Helpers
# ----------------------------------------------------------------------------
def _round_up(x, m):
    return ((x + m - 1) // m) * m


def _vmem_capacity_bytes():
    """Physical VMEM capacity; conservative 64 MiB (v7x) if query fails."""
    try:
        return int(pltpu.get_tpu_info().vmem_capacity_bytes)
    except Exception:
        return 64 << 20


# ----------------------------------------------------------------------------
# Kernels
# ----------------------------------------------------------------------------
def _expert_kernel_resident(x_ref, wgu_ref, wd_ref, o_ref, acc_ref):
    # x_ref:   (tm, H)          token tile (compute dtype)
    # wgu_ref: (nt, H, 2*ti)    ALL fused [gate|up] weight tiles (resident)
    # wd_ref:  (nt, ti, H)      ALL down_proj weight tiles (resident)
    # o_ref:   (tm, H)          output tile
    # acc_ref: (tm, H) f32      accumulator scratch
    nt = wd_ref.shape[0]
    ti = wd_ref.shape[1]
    x = x_ref[...]

    def tile_partial(t):
        gu = jnp.dot(x, wgu_ref[t], preferred_element_type=jnp.float32)
        g = gu[:, :ti]
        u = gu[:, ti:]
        h = (g * jax.nn.sigmoid(g)) * u
        return jnp.dot(h.astype(x.dtype), wd_ref[t],
                       preferred_element_type=jnp.float32)

    # First tile initializes the accumulator (no zero-fill pass).
    acc_ref[...] = tile_partial(0)

    @pl.loop(1, nt)
    def _(t):
        acc_ref[...] += tile_partial(t)

    o_ref[...] = acc_ref[...].astype(o_ref.dtype)


def _expert_kernel_tiled(x_ref, wgu_ref, wd_ref, o_ref, acc_ref):
    # x_ref:   (tm, H)          token tile (compute dtype)
    # wgu_ref: (1, H, 2*ti)     fused [gate_j | up_j] weight tile
    # wd_ref:  (1, ti, H)       down_proj weight tile
    # o_ref:   (tm, H)          output tile
    # acc_ref: (tm, H) f32      accumulator, resident across the I (j) axis
    j = pl.program_id(1)
    nj = pl.num_programs(1)
    ti = wd_ref.shape[1]

    x = x_ref[...]
    gu = jnp.dot(x, wgu_ref[0], preferred_element_type=jnp.float32)
    g = gu[:, :ti]
    u = gu[:, ti:]
    h = (g * jax.nn.sigmoid(g)) * u
    part = jnp.dot(h.astype(x.dtype), wd_ref[0],
                   preferred_element_type=jnp.float32)

    @pl.when(j == 0)
    def _():
        acc_ref[...] = part

    @pl.when(j > 0)
    def _():
        acc_ref[...] += part

    @pl.when(j == nj - 1)
    def _():
        o_ref[...] = acc_ref[...].astype(o_ref.dtype)


# ----------------------------------------------------------------------------
# One-time weight preparation (do this at init, NOT every forward call)
# ----------------------------------------------------------------------------
def prepare_expert_weights(wg, wu, wd, *, ti=None, compute_dtype=jnp.bfloat16):
    """wg/wu: (I, H) torch nn.Linear layout, wd: (H, I) torch layout.

    Returns (wgu (nt, H, 2*ti), wd_t (nt, ti, H), ti) in `compute_dtype`.
    The intermediate dim is zero-padded up to a multiple of 128 so every
    tile is lane-aligned (padded channels contribute SiLU(0)*0 = 0).
    Fused tile t holds [gate cols t*ti:(t+1)*ti | up cols t*ti:(t+1)*ti].
    """
    I, H = wg.shape
    assert wu.shape == (I, H) and wd.shape == (H, I)

    I_pad = _round_up(I, 128)
    if I_pad != I:
        pad = I_pad - I
        wg = jnp.pad(wg, ((0, pad), (0, 0)))
        wu = jnp.pad(wu, ((0, pad), (0, 0)))
        wd = jnp.pad(wd, ((0, 0), (0, pad)))

    if ti is None:
        # ti=512 only on big-VMEM parts (v5e/v6e, 128 MiB); 256 otherwise (v7x).
        max_ti = 512 if _vmem_capacity_bytes() >= (100 << 20) else 256
        ti = 128
        for cand in (512, 256, 128):
            if cand <= max_ti and I_pad % cand == 0:
                ti = cand
                break
    assert I_pad % ti == 0 and ti % 128 == 0
    nt = I_pad // ti

    wg_t = wg.T.astype(compute_dtype)   # (H, I_pad)
    wu_t = wu.T.astype(compute_dtype)   # (H, I_pad)
    wgu = jnp.concatenate(
        [wg_t.reshape(H, nt, ti).transpose(1, 0, 2),
         wu_t.reshape(H, nt, ti).transpose(1, 0, 2)],
        axis=2)                                     # (nt, H, 2*ti)
    wd_t = wd.T.astype(compute_dtype).reshape(nt, ti, H)  # (nt, ti, H)
    return wgu, wd_t, ti


# ----------------------------------------------------------------------------
# Forward wrapper
# ----------------------------------------------------------------------------
def deepseek_expert_forward(x, wgu, wd_t, ti, *, tm=256, force_tiled=False):
    """x: (..., H). wgu / wd_t / ti from prepare_expert_weights."""
    orig_shape = x.shape
    H = orig_shape[-1]
    nt, ti_w, Hd = wd_t.shape
    assert ti_w == ti and Hd == H
    assert wgu.shape == (nt, H, 2 * ti)

    compute_dtype = wgu.dtype
    out_dtype = x.dtype
    itemsize = jnp.dtype(compute_dtype).itemsize
    out_itemsize = jnp.dtype(out_dtype).itemsize

    x2 = x.reshape(-1, H)
    T = x2.shape[0]
    # Shrink the token tile for small token counts (decode / tests).
    tm = min(tm, _round_up(max(T, 1), 128))
    assert tm % 8 == 0
    Tp = _round_up(T, tm)
    if Tp != T:
        x2 = jnp.pad(x2, ((0, Tp - T), (0, 0)))
    x2 = x2.astype(compute_dtype)

    # ---- VMEM accounting (inputs/outputs double-buffered, f32 temps counted)
    vmem_cap = _vmem_capacity_bytes()
    x_tiles = 2 * tm * H * itemsize
    out_tiles = 2 * tm * H * out_itemsize
    acc_bytes = tm * H * 4
    temp_bytes = tm * (2 * ti) * 4 + 3 * tm * ti * 4      # gu + g/u/h (f32)
    weight_tile_bytes = 2 * (H * 2 * ti + ti * H) * itemsize
    weight_full_bytes = 2 * nt * (H * 2 * ti + ti * H) * itemsize

    resident_need = weight_full_bytes + x_tiles + out_tiles + acc_bytes + temp_bytes
    tiled_need = weight_tile_bytes + x_tiles + out_tiles + acc_bytes + temp_bytes

    use_resident = (not force_tiled) and resident_need <= int(0.75 * vmem_cap)
    need = resident_need if use_resident else tiled_need

    ceiling = max(vmem_cap - (8 << 20), 16 << 20)
    vmem_limit = int(min(max(need + (4 << 20), 16 << 20), ceiling))

    if use_resident:
        # Weights fetched once (constant index_map); kernel loops over I tiles.
        grid_spec = pltpu.PrefetchScalarGridSpec(
            num_scalar_prefetch=0,
            grid=(Tp // tm,),
            in_specs=[
                pl.BlockSpec((tm, H), lambda i: (i, 0)),
                pl.BlockSpec((nt, H, 2 * ti), lambda i: (0, 0, 0)),
                pl.BlockSpec((nt, ti, H), lambda i: (0, 0, 0)),
            ],
            out_specs=pl.BlockSpec((tm, H), lambda i: (i, 0)),
            scratch_shapes=[pltpu.VMEM((tm, H), jnp.float32)],
        )
        kernel = _expert_kernel_resident
        dim_sem = ("parallel",)
    else:
        grid_spec = pltpu.PrefetchScalarGridSpec(
            num_scalar_prefetch=0,
            grid=(Tp // tm, nt),
            in_specs=[
                pl.BlockSpec((tm, H), lambda i, j: (i, 0)),
                pl.BlockSpec((1, H, 2 * ti), lambda i, j: (j, 0, 0)),
                pl.BlockSpec((1, ti, H), lambda i, j: (j, 0, 0)),
            ],
            out_specs=pl.BlockSpec((tm, H), lambda i, j: (i, 0)),
            scratch_shapes=[pltpu.VMEM((tm, H), jnp.float32)],
        )
        kernel = _expert_kernel_tiled
        dim_sem = ("parallel", "arbitrary")

    out = pl.pallas_call(
        kernel,
        out_shape=jax.ShapeDtypeStruct((Tp, H), out_dtype),
        grid_spec=grid_spec,
        compiler_params=pltpu.CompilerParams(
            dimension_semantics=dim_sem,
            vmem_limit_bytes=vmem_limit,
        ),
    )(x2, wgu, wd_t)

    if Tp != T:
        out = out[:T]
    return out.reshape(orig_shape)


# ----------------------------------------------------------------------------
# Reference (pure JAX, matches the PyTorch module)
# ----------------------------------------------------------------------------
def _reference(x, wg, wu, wd):
    g = x @ wg.T
    u = x @ wu.T
    h = (g * jax.nn.sigmoid(g)) * u
    return h @ wd.T


if __name__ == "__main__":
    batch, seq, hidden, intermediate = 2, 8, 32, 192  # I pads 192 -> 256 (nt=2)

    key = jax.random.PRNGKey(0)
    kx, kg, ku, kd = jax.random.split(key, 4)

    x = jax.random.normal(kx, (batch, seq, hidden), dtype=jnp.float32)
    # nn.Linear weight layout: (out_features, in_features), no bias.
    wg = jax.random.normal(kg, (intermediate, hidden), dtype=jnp.float32) * 0.02
    wu = jax.random.normal(ku, (intermediate, hidden), dtype=jnp.float32) * 0.02
    wd = jax.random.normal(kd, (hidden, intermediate), dtype=jnp.float32) * 0.02

    y_ref = _reference(x, wg, wu, wd)

    # 1) f32 compute path, resident-weight mode — tight check.
    wgu_f32, wdt_f32, ti_f32 = prepare_expert_weights(
        wg, wu, wd, compute_dtype=jnp.float32)
    y_res = deepseek_expert_forward(x, wgu_f32, wdt_f32, ti_f32)
    jax.block_until_ready(y_res)
    assert y_res.shape == x.shape
    assert jnp.allclose(y_res, y_ref, atol=1e-4, rtol=1e-4), "f32 resident mismatch"

    # 2) f32 compute path, tiled (grid-reduction) mode — tight check.
    y_til = deepseek_expert_forward(x, wgu_f32, wdt_f32, ti_f32, force_tiled=True)
    jax.block_until_ready(y_til)
    assert jnp.allclose(y_til, y_ref, atol=1e-4, rtol=1e-4), "f32 tiled mismatch"

    # 3) bf16 compute path (production config) — loose check.
    wgu_bf16, wdt_bf16, ti_bf16 = prepare_expert_weights(
        wg, wu, wd, compute_dtype=jnp.bfloat16)
    y_bf16 = deepseek_expert_forward(x, wgu_bf16, wdt_bf16, ti_bf16)
    jax.block_until_ready(y_bf16)
    assert y_bf16.shape == x.shape
    assert jnp.allclose(y_bf16, y_ref, atol=5e-3, rtol=5e-2), "bf16 mismatch"

    print("KERNEL_OK")
</pallas_src>

<mosaic_0001>
module attributes {stable_mosaic.version = 11 : i64} {
  func.func @_expert_kernel_resident(%arg0: i32, %arg1: memref<128x32xf32, #tpu.memory_space<vmem>>, %arg2: memref<1x32x512xf32, #tpu.memory_space<vmem>>, %arg3: memref<1x256x32xf32, #tpu.memory_space<vmem>>, %arg4: memref<128x32xf32, #tpu.memory_space<vmem>>, %arg5: memref<128x32xf32, #tpu.memory_space<vmem>>) attributes {dimension_semantics = [#tpu.dimension_semantics<parallel>], iteration_bounds = array<i64: 1>, scalar_prefetch = 0 : i64, scratch_operands = 1 : i64, tpu.core_type = #tpu.core_type<tc>, window_params = [{transform_indices = @transform_0, window_bounds = array<i64: 128, 32>}, {pipeline_mode = #tpu.pipeline_mode<synchronous>, transform_indices = @transform_1, window_bounds = array<i64: 1, 32, 512>}, {pipeline_mode = #tpu.pipeline_mode<synchronous>, transform_indices = @transform_2, window_bounds = array<i64: 1, 256, 32>}, {transform_indices = @transform_3, window_bounds = array<i64: 128, 32>}]} {
    %c0 = arith.constant 0 : index
    %c0_0 = arith.constant 0 : index
    %0 = vector.load %arg1[%c0, %c0_0] : memref<128x32xf32, #tpu.memory_space<vmem>>, vector<128x32xf32>
    %c0_1 = arith.constant 0 : index
    %c0_2 = arith.constant 0 : index
    %c0_3 = arith.constant 0 : index
    %1 = vector.load %arg2[%c0_1, %c0_2, %c0_3] : memref<1x32x512xf32, #tpu.memory_space<vmem>>, vector<1x32x512xf32>
    %2 = vector.shape_cast %1 : vector<1x32x512xf32> to vector<32x512xf32>
    %cst = arith.constant dense<0.000000e+00> : vector<128x512xf32>
    %3 = tpu.matmul %0, %2, %cst {dimension_numbers = #tpu.dot_dimension_numbers<[1], [0], [0], [1], [0, 0, 1, 1], [], []>} : vector<128x32xf32>, vector<32x512xf32>, vector<128x512xf32> -> vector<128x512xf32>
    %4 = vector.extract_strided_slice %3 {offsets = [0, 0], sizes = [128, 256], strides = [1, 1]} : vector<128x512xf32> to vector<128x256xf32>
    %5 = vector.extract_strided_slice %3 {offsets = [0, 256], sizes = [128, 256], strides = [1, 1]} : vector<128x512xf32> to vector<128x256xf32>
    %6 = arith.negf %4 : vector<128x256xf32>
    %7 = math.exp %6 : vector<128x256xf32>
    %cst_4 = arith.constant 1.000000e+00 : f32
    %8 = vector.broadcast %cst_4 : f32 to vector<128x256xf32>
    %9 = arith.addf %8, %7 : vector<128x256xf32>
    %10 = arith.divf %8, %9 : vector<128x256xf32>
    %11 = arith.mulf %4, %10 : vector<128x256xf32>
    %12 = arith.mulf %11, %5 : vector<128x256xf32>
    %c0_5 = arith.constant 0 : index
    %c0_6 = arith.constant 0 : index
    %c0_7 = arith.constant 0 : index
    %13 = vector.load %arg3[%c0_5, %c0_6, %c0_7] : memref<1x256x32xf32, #tpu.memory_space<vmem>>, vector<1x256x32xf32>
    %14 = vector.shape_cast %13 : vector<1x256x32xf32> to vector<256x32xf32>
    %cst_8 = arith.constant dense<0.000000e+00> : vector<128x32xf32>
    %15 = tpu.matmul %12, %14, %cst_8 {dimension_numbers = #tpu.dot_dimension_numbers<[1], [0], [0], [1], [0, 0, 1, 1], [], []>} : vector<128x256xf32>, vector<256x32xf32>, vector<128x32xf32> -> vector<128x32xf32>
    %c0_9 = arith.constant 0 : index
    %c0_10 = arith.constant 0 : index
    %16 = vector.load %arg5[%c0_9, %c0_10] : memref<128x32xf32, #tpu.memory_space<vmem>>, vector<128x32xf32>
    tpu.vector_store %arg5[%c0_9, %c0_10], %15 {strides = array<i32>} : memref<128x32xf32, #tpu.memory_space<vmem>>, vector<128x32xf32>,
    %c0_i32 = arith.constant 0 : i32
    %c0_i32_11 = arith.constant 0 : i32
    %17 = arith.addi %c0_i32, %c0_i32_11 : i32
    %c1_i32 = arith.constant 1 : i32
    scf.for %arg6 = %c0_i32 to %17 step %c1_i32  : i32 {
      %c1_i32_17 = arith.constant 1 : i32
      %20 = arith.muli %arg6, %c1_i32_17 : i32
      %c1_i32_18 = arith.constant 1 : i32
      %21 = arith.addi %c1_i32_18, %20 : i32
      %c0_19 = arith.constant 0 : index
      %c0_20 = arith.constant 0 : index
      %22 = vector.load %arg5[%c0_19, %c0_20] : memref<128x32xf32, #tpu.memory_space<vmem>>, vector<128x32xf32>
      %23 = arith.index_cast %21 : i32 to index
      %c0_21 = arith.constant 0 : index
      %c0_22 = arith.constant 0 : index
      %24 = vector.load %arg2[%23, %c0_21, %c0_22] : memref<1x32x512xf32, #tpu.memory_space<vmem>>, vector<1x32x512xf32>
      %25 = vector.shape_cast %24 : vector<1x32x512xf32> to vector<32x512xf32>
      %cst_23 = arith.constant dense<0.000000e+00> : vector<128x512xf32>
      %26 = tpu.matmul %0, %25, %cst_23 {dimension_numbers = #tpu.dot_dimension_numbers<[1], [0], [0], [1], [0, 0, 1, 1], [], []>} : vector<128x32xf32>, vector<32x512xf32>, vector<128x512xf32> -> vector<128x512xf32>
      %27 = vector.extract_strided_slice %26 {offsets = [0, 0], sizes = [128, 256], strides = [1, 1]} : vector<128x512xf32> to vector<128x256xf32>
      %28 = vector.extract_strided_slice %26 {offsets = [0, 256], sizes = [128, 256], strides = [1, 1]} : vector<128x512xf32> to vector<128x256xf32>
      %29 = arith.negf %27 : vector<128x256xf32>
      %30 = math.exp %29 : vector<128x256xf32>
      %cst_24 = arith.constant 1.000000e+00 : f32
      %31 = vector.broadcast %cst_24 : f32 to vector<128x256xf32>
      %32 = arith.addf %31, %30 : vector<128x256xf32>
      %33 = arith.divf %31, %32 : vector<128x256xf32>
      %34 = arith.mulf %27, %33 : vector<128x256xf32>
      %35 = arith.mulf %34, %28 : vector<128x256xf32>
      %36 = arith.index_cast %21 : i32 to index
      %c0_25 = arith.constant 0 : index
      %c0_26 = arith.constant 0 : index
      %37 = vector.load %arg3[%36, %c0_25, %c0_26] : memref<1x256x32xf32, #tpu.memory_space<vmem>>, vector<1x256x32xf32>
      %38 = vector.shape_cast %37 : vector<1x256x32xf32> to vector<256x32xf32>
      %cst_27 = arith.constant dense<0.000000e+00> : vector<128x32xf32>
      %39 = tpu.matmul %35, %38, %cst_27 {dimension_numbers = #tpu.dot_dimension_numbers<[1], [0], [0], [1], [0, 0, 1, 1], [], []>} : vector<128x256xf32>, vector<256x32xf32>, vector<128x32xf32> -> vector<128x32xf32>
      %40 = arith.addf %22, %39 : vector<128x32xf32>
      %c0_28 = arith.constant 0 : index
      %c0_29 = arith.constant 0 : index
      %41 = vector.load %arg5[%c0_28, %c0_29] : memref<128x32xf32, #tpu.memory_space<vmem>>, vector<128x32xf32>
      tpu.vector_store %arg5[%c0_28, %c0_29], %40 {strides = array<i32>} : memref<128x32xf32, #tpu.memory_space<vmem>>, vector<128x32xf32>,
    }
    %c0_i32_12 = arith.constant 0 : i32
    %c0_13 = arith.constant 0 : index
    %c0_14 = arith.constant 0 : index
    %18 = vector.load %arg5[%c0_13, %c0_14] : memref<128x32xf32, #tpu.memory_space<vmem>>, vector<128x32xf32>
    %c0_15 = arith.constant 0 : index
    %c0_16 = arith.constant 0 : index
    %19 = vector.load %arg4[%c0_15, %c0_16] : memref<128x32xf32, #tpu.memory_space<vmem>>, vector<128x32xf32>
    tpu.vector_store %arg4[%c0_15, %c0_16], %18 {strides = array<i32>} : memref<128x32xf32, #tpu.memory_space<vmem>>, vector<128x32xf32>,
    return
  }
  func.func @transform_0(%arg0: i32) -> (i32, i32) {
    %c0_i32 = arith.constant 0 : i32
    %c0_i32_0 = arith.constant 0 : i32
    return %arg0, %c0_i32 : i32, i32
  }
  func.func @transform_1(%arg0: i32) -> (i32, i32, i32) {
    %c0_i32 = arith.constant 0 : i32
    %c0_i32_0 = arith.constant 0 : i32
    %c0_i32_1 = arith.constant 0 : i32
    %c0_i32_2 = arith.constant 0 : i32
    return %c0_i32, %c0_i32_0, %c0_i32_1 : i32, i32, i32
  }
  func.func @transform_2(%arg0: i32) -> (i32, i32, i32) {
    %c0_i32 = arith.constant 0 : i32
    %c0_i32_0 = arith.constant 0 : i32
    %c0_i32_1 = arith.constant 0 : i32
    %c0_i32_2 = arith.constant 0 : i32
    return %c0_i32, %c0_i32_0, %c0_i32_1 : i32, i32, i32
  }
  func.func @transform_3(%arg0: i32) -> (i32, i32) {
    %c0_i32 = arith.constant 0 : i32
    %c0_i32_0 = arith.constant 0 : i32
    return %arg0, %c0_i32 : i32, i32
  }
}

</mosaic_0001>

<bundles_post_ra>
// kernel: tpu_custom_call.1
= control target key start
LH: loop header
LB: loop body
LE: loop exit
PB: predicated region body
PF: predicated region fallthrough
CT: control target
= control target key end

     0   :  { %v1183_v3 = vmov 0.0   ;;  %vm46_vm0 = vcmask 261120   ;;  %s1736_s1 = inlined_call_operand.vmem [shape: f32[1,32,512], index: 1, kind: input, shape index: {}]   ;;  %s1737_s0 = inlined_call_operand.vmem [shape: f32[128,32], index: 0, kind: input, shape index: {}]   ;;  %s1738_s2 = inlined_call_operand.vmem [shape: f32[1,256,32], index: 2, kind: input, shape index: {}]   ;;  %s1739_s3 = inlined_call_operand.vmem [shape: f32[128,32], index: 3, kind: output, shape index: {}]  }
   0x1   :  { %v43_v0 = vld [vmem:[%s1736_s1 + $0x68] sm:$0xff]  ;;  %v42_v1 = vld [vmem:[%s1736_s1 + $0x60] sm:$0xff]  ;;  %159 = vmatprep.mubr.f32.mxu0 %v1183_v3  ;;  %207 = vmatprep.mubr.f32.mxu1 %v1183_v3  ;;  %v45_v11 = vld [vmem:[%s1736_s1 + $0x78] sm:$0xff] }
   0x2   :  { %v39_v2 = vld [vmem:[%s1736_s1 + $0x48] sm:$0xff]  ;;  %119 = vmatprep.subr.mxu0 %v43_v0  ;;  %1046 = vmatprep.subr.mxu1 %v43_v0  ;;  %v38_v4 = vld [vmem:[%s1736_s1 + $0x40] sm:$0xff]  ;;  %v44_v12 = vld [vmem:[%s1736_s1 + $0x70] sm:$0xff] }
   0x3   :  { %120 = vmatpush1.msra.mxu0 %v42_v1  ;;  %1050 = vmatpush1.msra.mxu1 %v42_v1  ;;  %v35_v5 = vld [vmem:[%s1736_s1 + $0x28] sm:$0xff]  ;;  %v34_v6 = vld [vmem:[%s1736_s1 + $0x20] sm:$0xff]  ;;  %v41_v13 = vld [vmem:[%s1736_s1 + $0x58] sm:$0xff] }
   0x4   :  { %121 = vmatprep.subr.mxu0 %v39_v2  ;;  %1047 = vmatprep.subr.mxu1 %v39_v2  ;;  %v31_v7 = vld [vmem:[%s1736_s1 + $0x8] sm:$0xff]  ;;  %v30_v8 = vld [vmem:[%s1736_s1] sm:$0xff]  ;;  %v40_v16 = vld [vmem:[%s1736_s1 + $0x50] sm:$0xff] }
   0x5   :  { %122 = vmatpush1.msra.mxu0 %v38_v4  ;;  %1051 = vmatpush1.msra.mxu1 %v38_v4  ;;  %v1233_v9 = vld [vmem:[%s1737_s0] sm:$0xff]  ;;  %v15_v14 = vld [vmem:[%s1737_s0 + $0x8] sm:$0xff]  ;;  %v37_v17 = vld [vmem:[%s1736_s1 + $0x38] sm:$0xff] }
   0x6   :  { %123 = vmatprep.subr.mxu0 %v35_v5  ;;  %1048 = vmatprep.subr.mxu1 %v35_v5  ;;  %v1238_v10 = vld [vmem:[%s1737_s0 + $0x40] sm:$0xff]  ;;  %v1260_v15 = vld [vmem:[%s1737_s0 + $0x48] sm:$0xff]  ;;  %v16_v18 = vld [vmem:[%s1737_s0 + $0x10] sm:$0xff] }
   0x7   :  { %124 = vmatpush1.msra.mxu0 %v34_v6  ;;  %1052 = vmatpush1.msra.mxu1 %v34_v6  ;;  %v1280_v19 = vld [vmem:[%s1737_s0 + $0x50] sm:$0xff]  ;;  %v33_v21 = vld [vmem:[%s1736_s1 + $0x18] sm:$0xff]  ;;  %v18_v25 = vld [vmem:[%s1737_s0 + $0x20] sm:$0xff] }
   0x8   :  { %125 = vmatprep.subr.mxu0 %v31_v7  ;;  %1049 = vmatprep.subr.mxu1 %v31_v7  ;;  %v36_v20 = vld [vmem:[%s1736_s1 + $0x30] sm:$0xff]  ;;  %v17_v22 = vld [vmem:[%s1737_s0 + $0x18] sm:$0xff]  ;;  %v1312_v26 = vld [vmem:[%s1737_s0 + $0x60] sm:$0xff] }
   0x9   :  { %126 = vmatpush1.msra.mxu0 %v30_v8  ;;  %1053 = vmatpush1.msra.mxu1 %v30_v8  ;;  %v25_v23 = vld [vmem:[%s1737_s0 + $0x58] sm:$0xff]  ;;  %v32_v24 = vld [vmem:[%s1736_s1 + $0x10] sm:$0xff]  ;;  %v19_v27 = vld [vmem:[%s1737_s0 + $0x28] sm:$0xff] }
   0xa   :  { %902 = vmatmul.mubr.msk.f32.vlgmr.msra.gmra.mxu0 %vm46_vm0, %v1233_v9  ;;  %910 = vmatmul.mubr.msk.f32.vlgmr.msra.gmra.mxu1 %vm46_vm0, %v1238_v10  ;;  %v27_v28 = vld [vmem:[%s1737_s0 + $0x68] sm:$0xff]  ;;  %v20_v29 = vld [vmem:[%s1737_s0 + $0x30] sm:$0xff]  ;;  %v21_v31 = vld [vmem:[%s1737_s0 + $0x38] sm:$0xff] }
   0xb   :  { %280 = vmatprep.subr.mxu1 %v45_v11  ;;  %165 = vmatprep.mubr.f32.mxu0 %v1183_v3  ;;  %v28_v30 = vld [vmem:[%s1737_s0 + $0x70] sm:$0xff]  ;;  %v29_v32 = vld [vmem:[%s1737_s0 + $0x78] sm:$0xff]  ;;  %v702_v37 = vld [vmem:[%s1738_s2 + $0xe8] sm:$0xff] }
   0xc   :  { %281 = vmatpush1.msra.mxu1 %v44_v12  ;;  %213 = vmatprep.mubr.f32.mxu1 %v1183_v3  ;;  %v704_v33 = vld [vmem:[%s1738_s2 + $0xf8] sm:$0xff]  ;;  %v703_v35 = vld [vmem:[%s1738_s2 + $0xf0] sm:$0xff]  ;;  %v686_v38 = vld [vmem:[%s1738_s2 + $0x68] sm:$0xff] }
   0xd   :  { %282 = vmatprep.subr.mxu1 %v41_v13  ;;  %966 = vmatprep.subr.mxu0 %v704_v33  ;;  %v688_v34 = vld [vmem:[%s1738_s2 + $0x78] sm:$0xff]  ;;  %v687_v36 = vld [vmem:[%s1738_s2 + $0x70] sm:$0xff]  ;;  %v701_v39 = vld [vmem:[%s1738_s2 + $0xe0] sm:$0xff] }
   0xe   :  { %903 = vmatmul.mubr.msk.f32.gmra.mxu0 %vm46_vm0, %v15_v14  ;;  %911 = vmatmul.mubr.msk.f32.gmra.mxu1 %vm46_vm0, %v1260_v15  ;;  %v685_v40 = vld [vmem:[%s1738_s2 + $0x60] sm:$0xff]  ;;  %v700_v41 = vld [vmem:[%s1738_s2 + $0xd8] sm:$0xff]  ;;  %v699_v43 = vld [vmem:[%s1738_s2 + $0xd0] sm:$0xff] }
   0xf   :  { %171 = vmatprep.mubr.f32.mxu0 %v1183_v3  ;;  %219 = vmatprep.mubr.f32.mxu1 %v1183_v3  ;;  %v684_v42 = vld [vmem:[%s1738_s2 + $0x58] sm:$0xff]  ;;  %v683_v44 = vld [vmem:[%s1738_s2 + $0x50] sm:$0xff]  ;;  %v698_v45 = vld [vmem:[%s1738_s2 + $0xc8] sm:$0xff] }
  0x10   :  { %283 = vmatpush1.msra.mxu1 %v40_v16  ;;  %967 = vmatpush3.msra.mxu0 %v688_v34  ;;  %v682_v46 = vld [vmem:[%s1738_s2 + $0x48] sm:$0xff]  ;;  %v697_v47 = vld [vmem:[%s1738_s2 + $0xc0] sm:$0xff]  ;;  %v696_v49 = vld [vmem:[%s1738_s2 + $0xb8] sm:$0xff] }
  0x11   :  { %284 = vmatprep.subr.mxu1 %v37_v17  ;;  %968 = vmatprep.subr.mxu0 %v703_v35  ;;  %v681_v48 = vld [vmem:[%s1738_s2 + $0x40] sm:$0xff]  ;;  %v680_v50 = vld [vmem:[%s1738_s2 + $0x38] sm:$0xff]  ;;  %v695_v51 = vld [vmem:[%s1738_s2 + $0xb0] sm:$0xff] }
  0x12   :  { %904 = vmatmul.mubr.msk.f32.gmra.mxu0 %vm46_vm0, %v16_v18  ;;  %912 = vmatmul.mubr.msk.f32.gmra.mxu1 %vm46_vm0, %v1280_v19  ;;  %v679_v52 = vld [vmem:[%s1738_s2 + $0x30] sm:$0xff]  ;;  %v694_v53 = vld [vmem:[%s1738_s2 + $0xa8] sm:$0xff]  ;;  %v693_v55 = vld [vmem:[%s1738_s2 + $0xa0] sm:$0xff] }
  0x13   :  { %177 = vmatprep.mubr.f32.mxu0 %v1183_v3  ;;  %225 = vmatprep.mubr.f32.mxu1 %v1183_v3  ;;  %v678_v54 = vld [vmem:[%s1738_s2 + $0x28] sm:$0xff]  ;;  %v677_v56 = vld [vmem:[%s1738_s2 + $0x20] sm:$0xff]  ;;  %v692_v57 = vld [vmem:[%s1738_s2 + $0x98] sm:$0xff] }
  0x14   :  { %285 = vmatpush1.msra.mxu1 %v36_v20  ;;  %969 = vmatpush3.msra.mxu0 %v687_v36  ;;  %v676_v58 = vld [vmem:[%s1738_s2 + $0x18] sm:$0xff]  ;;  %v691_v59 = vld [vmem:[%s1738_s2 + $0x90] sm:$0xff]  ;;  %v690_v61 = vld [vmem:[%s1738_s2 + $0x88] sm:$0xff] }
  0x15   :  { %286 = vmatprep.subr.mxu1 %v33_v21  ;;  %970 = vmatprep.subr.mxu0 %v702_v37  ;;  %v675_v60 = vld [vmem:[%s1738_s2 + $0x10] sm:$0xff]  ;;  %v674_v62 = vld [vmem:[%s1738_s2 + $0x8] sm:$0xff]  ;;  %v689_v63 = vld [vmem:[%s1738_s2 + $0x80] sm:$0xff] }
  0x16   :  { %905 = vmatmul.mubr.msk.f32.gmra.mxu0 %vm46_vm0, %v17_v22  ;;  %913 = vmatmul.mubr.msk.f32.gmra.mxu1 %vm46_vm0, %v25_v23  ;;  %v673_v0 = vld [vmem:[%s1738_s2] sm:$0xff] }
  0x17   :  { %183 = vmatprep.mubr.f32.mxu0 %v1183_v3  ;;  %231 = vmatprep.mubr.f32.mxu1 %v1183_v3 }
  0x18   :  { %287 = vmatpush1.msra.mxu1 %v32_v24  ;;  %971 = vmatpush3.msra.mxu0 %v686_v38 }
  0x19   :  { %972 = vmatprep.subr.mxu0 %v701_v39 }
  0x1a   :  { %906 = vmatmul.mubr.msk.f32.gmra.mxu0 %vm46_vm0, %v18_v25  ;;  %914 = vmatmul.mubr.msk.f32.gmra.mxu1 %vm46_vm0, %v1312_v26 }
  0x1b   :  { %189 = vmatprep.mubr.f32.mxu0 %v1183_v3  ;;  %237 = vmatprep.mubr.f32.mxu1 %v1183_v3 }
  0x1c   :  { %973 = vmatpush3.msra.mxu0 %v685_v40 }
  0x1d   :  { %974 = vmatprep.subr.mxu0 %v700_v41 }
  0x1e   :  { %907 = vmatmul.mubr.msk.f32.gmra.mxu0 %vm46_vm0, %v19_v27  ;;  %915 = vmatmul.mubr.msk.f32.gmra.mxu1 %vm46_vm0, %v27_v28 }
  0x1f   :  { %195 = vmatprep.mubr.f32.mxu0 %v1183_v3  ;;  %243 = vmatprep.mubr.f32.mxu1 %v1183_v3 }
  0x20   :  { %975 = vmatpush3.msra.mxu0 %v684_v42 }
  0x21   :  { %976 = vmatprep.subr.mxu0 %v699_v43 }
  0x22   :  { %908 = vmatmul.mubr.msk.f32.gmra.mxu0 %vm46_vm0, %v20_v29  ;;  %916 = vmatmul.mubr.msk.f32.gmra.mxu1 %vm46_vm0, %v28_v30 }
  0x23   :  { %201 = vmatprep.mubr.f32.mxu0 %v1183_v3  ;;  %249 = vmatprep.mubr.f32.mxu1 %v1183_v3 }
  0x24   :  { %977 = vmatpush3.msra.mxu0 %v683_v44 }
  0x25   :  { %978 = vmatprep.subr.mxu0 %v698_v45 }
  0x26   :  { %909 = vmatmul.mubr.msk.f32.gmra.mxu0 %vm46_vm0, %v21_v31  ;;  %917 = vmatmul.mubr.msk.f32.gmra.mxu1 %vm46_vm0, %v29_v32 }
  0x27   :  { %320 = vmatprep.mubr.f32.mxu1 %v1183_v3  ;;  %979 = vmatpush3.msra.mxu0 %v682_v46 }
  0x28   :  { %980 = vmatprep.subr.mxu0 %v697_v47 }
  0x29   :  { %981 = vmatpush3.msra.mxu0 %v681_v48 }
  0x2a   :  { %918 = vmatmul.mubr.msk.f32.vlgmr.msra.gmra.mxu1 %vm46_vm0, %v1233_v9  ;;  %982 = vmatprep.subr.mxu0 %v696_v49 }
  0x2b   :  { %326 = vmatprep.mubr.f32.mxu1 %v1183_v3  ;;  %983 = vmatpush3.msra.mxu0 %v680_v50 }
  0x2c   :  { %984 = vmatprep.subr.mxu0 %v695_v51 }
  0x2d   :  { %985 = vmatpush3.msra.mxu0 %v679_v52 }
  0x2e   :  { %919 = vmatmul.mubr.msk.f32.gmra.mxu1 %vm46_vm0, %v15_v14  ;;  %986 = vmatprep.subr.mxu0 %v694_v53 }
  0x2f   :  { %332 = vmatprep.mubr.f32.mxu1 %v1183_v3  ;;  %987 = vmatpush3.msra.mxu0 %v678_v54 }
  0x30   :  { %988 = vmatprep.subr.mxu0 %v693_v55 }
  0x31   :  { %989 = vmatpush3.msra.mxu0 %v677_v56 }
  0x32   :  { %920 = vmatmul.mubr.msk.f32.gmra.mxu1 %vm46_vm0, %v16_v18  ;;  %990 = vmatprep.subr.mxu0 %v692_v57 }
  0x33   :  { %338 = vmatprep.mubr.f32.mxu1 %v1183_v3  ;;  %991 = vmatpush3.msra.mxu0 %v676_v58 }
  0x34   :  { %992 = vmatprep.subr.mxu0 %v691_v59 }
  0x35   :  { %993 = vmatpush3.msra.mxu0 %v675_v60 }
  0x36   :  { %921 = vmatmul.mubr.msk.f32.gmra.mxu1 %vm46_vm0, %v17_v22  ;;  %994 = vmatprep.subr.mxu0 %v690_v61 }
  0x37   :  { %344 = vmatprep.mubr.f32.mxu1 %v1183_v3  ;;  %995 = vmatpush3.msra.mxu0 %v674_v62 }
  0x38   :  { %996 = vmatprep.subr.mxu0 %v689_v63 }
  0x39   :  { %997 = vmatpush3.msra.mxu0 %v673_v0 }
  0x3a   :  { %922 = vmatmul.mubr.msk.f32.gmra.mxu1 %vm46_vm0, %v18_v25 }
  0x3b   :  { %350 = vmatprep.mubr.f32.mxu1 %v1183_v3 }
  0x3e   :  { %923 = vmatmul.mubr.msk.f32.gmra.mxu1 %vm46_vm0, %v19_v27 }
  0x3f   :  { %356 = vmatprep.mubr.f32.mxu1 %v1183_v3 }
  0x42   :  { %924 = vmatmul.mubr.msk.f32.gmra.mxu1 %vm46_vm0, %v20_v29 }
  0x43   :  { %362 = vmatprep.mubr.f32.mxu1 %v1183_v3 }
  0x46   :  { %925 = vmatmul.mubr.msk.f32.gmra.mxu1 %vm46_vm0, %v21_v31 }
  0x47   :  { %368 = vmatprep.mubr.f32.mxu1 %v1183_v3 }
  0x4a   :  { %926 = vmatmul.mubr.msk.f32.gmra.mxu1 %vm46_vm0, %v1238_v10 }
  0x4b   :  { %374 = vmatprep.mubr.f32.mxu1 %v1183_v3 }
  0x4e   :  { %927 = vmatmul.mubr.msk.f32.gmra.mxu1 %vm46_vm0, %v1260_v15 }
  0x4f   :  { %380 = vmatprep.mubr.f32.mxu1 %v1183_v3 }
  0x52   :  { %928 = vmatmul.mubr.msk.f32.gmra.mxu1 %vm46_vm0, %v1280_v19 }
  0x53   :  { %386 = vmatprep.mubr.f32.mxu1 %v1183_v3 }
  0x56   :  { %929 = vmatmul.mubr.msk.f32.gmra.mxu1 %vm46_vm0, %v25_v23 }
  0x57   :  { %392 = vmatprep.mubr.f32.mxu1 %v1183_v3 }
  0x5a   :  { %930 = vmatmul.mubr.msk.f32.gmra.mxu1 %vm46_vm0, %v1312_v26 }
  0x5b   :  { %398 = vmatprep.mubr.f32.mxu1 %v1183_v3 }
  0x5e   :  { %931 = vmatmul.mubr.msk.f32.gmra.mxu1 %vm46_vm0, %v27_v28 }
  0x5f   :  { %404 = vmatprep.mubr.f32.mxu1 %v1183_v3 }
  0x62   :  { %932 = vmatmul.mubr.msk.f32.gmra.mxu1 %vm46_vm0, %v28_v30 }
  0x63   :  { %410 = vmatprep.mubr.f32.mxu1 %v1183_v3 }
  0x66   :  { %933 = vmatmul.mubr.msk.f32.gmra.mxu1 %vm46_vm0, %v29_v32 }
  0xca   :  { %v1480_v1 = vpop.f32.mrf.mxu0  ;;  %v1482_v2 = vpop.f32.mrf.mxu1 }
  0xcb   :  { %v934_v3 = vmul.f32 -1.442695, %v1480_v1  ;;  %v950_v56 = vmul.f32 -1.442695, %v1482_v2 }
  0xcc   :  { %v1485_v4 = vpop.f32.mrf.mxu0  ;;  %v1487_v5 = vpop.f32.mrf.mxu1 }
  0xcd   :  { %1055 = vpow2.f32 %v934_v3  ;;  %v935_v6 = vmul.f32 -1.442695, %v1485_v4 }
  0xce   :  { %v1490_v7 = vpop.f32.mrf.mxu0  ;;  %v1492_v8 = vpop.f32.mrf.mxu1 }
  0xcf   :  { %1057 = vpow2.f32 %v935_v6  ;;  %v936_v9 = vmul.f32 -1.442695, %v1490_v7  ;;  %v951_v6 = vmul.f32 -1.442695, %v1487_v5 }
  0xd0   :  { %v1495_v10 = vpop.f32.mrf.mxu0  ;;  %v1497_v11 = vpop.f32.mrf.mxu1 }
  0xd1   :  { %1059 = vpow2.f32 %v936_v9  ;;  %v937_v12 = vmul.f32 -1.442695, %v1495_v10 }
  0xd2   :  { %v1500_v13 = vpop.f32.mrf.mxu0  ;;  %v1502_v14 = vpop.f32.mrf.mxu1 }
  0xd3   :  { %1061 = vpow2.f32 %v937_v12  ;;  %v938_v15 = vmul.f32 -1.442695, %v1500_v13 }
  0xd4   :  { %v1505_v16 = vpop.f32.mrf.mxu0  ;;  %v1507_v17 = vpop.f32.mrf.mxu1 }
  0xd5   :  { %1063 = vpow2.f32 %v938_v15  ;;  %v939_v18 = vmul.f32 -1.442695, %v1505_v16 }
  0xd6   :  { %v1510_v19 = vpop.f32.mrf.mxu0  ;;  %v1512_v20 = vpop.f32.mrf.mxu1 }
  0xd7   :  { %1065 = vpow2.f32 %v939_v18  ;;  %v940_v21 = vmul.f32 -1.442695, %v1510_v19 }
  0xd8   :  { %v1515_v22 = vpop.f32.mrf.mxu0  ;;  %v1517_v23 = vpop.f32.mrf.mxu1 }
  0xd9   :  { %1067 = vpow2.f32 %v940_v21  ;;  %v941_v24 = vmul.f32 -1.442695, %v1515_v22 }
  0xda   :  { %v1056_v25 = vpop.eup %1055  ;;  %v1520_v26 = vpop.f32.mrf.mxu0 }
  0xdb   :  { %v1522_v27 = vpop.f32.mrf.mxu1  ;;  %v513_v28 = vadd.f32 1.0, %v1056_v25  ;;  %1069 = vpow2.f32 %v941_v24  ;;  %v942_v54 = vmul.f32 -1.442695, %v1520_v26 }
  0xdc   :  { %v1058_v29 = vpop.eup %1057  ;;  %v1524_v30 = vpop.f32.mrf.mxu0 }
  0xdd   :  { %v1526_v31 = vpop.f32.mrf.mxu1  ;;  %1071 = vrcp.f32 %v513_v28  ;;  %v514_v32 = vadd.f32 1.0, %v1058_v29  ;;  %v943_v58 = vmul.f32 -1.442695, %v1524_v30 }
  0xde   :  { %v1060_v33 = vpop.eup %1059  ;;  %v1530_v37 = vpop.f32.mrf.mxu0 }
  0xdf   :  { %v1528_v34 = vpop.f32.mrf.mxu1  ;;  %1073 = vrcp.f32 %v514_v32  ;;  %v515_v35 = vadd.f32 1.0, %v1060_v33  ;;  %v944_v0 = vmul.f32 -1.442695, %v1530_v37  ;;  %v952_v32 = vmul.f32 -1.442695, %v1492_v8 }
  0xe0   :  { %v1062_v36 = vpop.eup %1061  ;;  %v1536_v44 = vpop.f32.mrf.mxu0 }
  0xe1   :  { %v1532_v38 = vpop.f32.mrf.mxu1  ;;  %1075 = vrcp.f32 %v515_v35  ;;  %v516_v39 = vadd.f32 1.0, %v1062_v36  ;;  %v945_v12 = vmul.f32 -1.442695, %v1536_v44 }
  0xe2   :  { %v1064_v40 = vpop.eup %1063  ;;  %v1542_v51 = vpop.f32.mrf.mxu0 }
  0xe3   :  { %v1534_v41 = vpop.f32.mrf.mxu1  ;;  %1077 = vrcp.f32 %v516_v39  ;;  %v517_v42 = vadd.f32 1.0, %v1064_v40  ;;  %v946_v28 = vmul.f32 -1.442695, %v1542_v51  ;;  %v953_v39 = vmul.f32 -1.442695, %v1497_v11 }
  0xe4   :  { %v1066_v43 = vpop.eup %1065  ;;  %v1550_v61 = vpop.f32.mrf.mxu0 }
  0xe5   :  { %v1538_v45 = vpop.f32.mrf.mxu1  ;;  %1079 = vrcp.f32 %v517_v42  ;;  %v518_v46 = vadd.f32 1.0, %v1066_v43  ;;  %v947_v35 = vmul.f32 -1.442695, %v1550_v61 }
  0xe6   :  { %v1068_v47 = vpop.eup %1067  ;;  %v1557_v21 = vpop.f32.mrf.mxu0 }
  0xe7   :  { %v1540_v48 = vpop.f32.mrf.mxu1  ;;  %1081 = vrcp.f32 %v518_v46  ;;  %v519_v49 = vadd.f32 1.0, %v1068_v47  ;;  %v948_v47 = vmul.f32 -1.442695, %v1557_v21 }
  0xe8   :  { %v1070_v50 = vpop.eup %1069 }
  0xe9   :  { %v1544_v52 = vpop.f32.mrf.mxu1  ;;  %1083 = vrcp.f32 %v519_v49  ;;  %v520_v53 = vadd.f32 1.0, %v1070_v50  ;;  %v954_v50 = vmul.f32 -1.442695, %v1502_v14 }
  0xea   :  { %v1072_v55 = vpop.eup %1071 }
  0xeb   :  { %v322_v57 = vpop.f32.mrf.mxu1  ;;  %1085 = vrcp.f32 %v520_v53  ;;  %v609_v60 = vmul.f32 %v1072_v55, %v1480_v1 }
  0xec   :  { %v1074_v59 = vpop.eup %1073  ;;  %1087 = vpow2.f32 %v942_v54 }
  0xed   :  { %v324_v62 = vpop.f32.mrf.mxu1  ;;  %v610_v63 = vmul.f32 %v1074_v59, %v1485_v4  ;;  %1089 = vpow2.f32 %v950_v56  ;;  %v641_v24 = vmul.f32 %v609_v60, %v322_v57  ;;  %v955_v56 = vmul.f32 -1.442695, %v1507_v17 }
  0xee   :  { %v1076_v3 = vpop.eup %1075  ;;  %1091 = vpow2.f32 %v943_v58 }
  0xef   :  { %v328_v9 = vpop.f32.mrf.mxu1  ;;  %v642_v15 = vmul.f32 %v610_v63, %v324_v62  ;;  %v611_v1 = vmul.f32 %v1076_v3, %v1490_v7  ;;  %1093 = vpow2.f32 %v944_v0  ;;  %v956_v62 = vmul.f32 -1.442695, %v1512_v20 }
  0xf0   :  { %v1078_v18 = vpop.eup %1077  ;;  %1095 = vpow2.f32 %v951_v6 }
  0xf1   :  { %v330_v25 = vpop.f32.mrf.mxu1  ;;  %v612_v4 = vmul.f32 %v1078_v18, %v1495_v10  ;;  %769 = vmatprep.mubr.f32.mxu0 %v642_v15  ;;  %1097 = vpow2.f32 %v945_v12  ;;  %v1565_v10 = vpop.f32.mrf.mxu0  ;;  %v643_v42 = vmul.f32 %v611_v1, %v328_v9 }
  0xf2   :  { %v1080_v29 = vpop.eup %1079  ;;  %770 = vmatmul.mubr.f32.vlgmr.msra.gmra.mxu0 %v641_v24  ;;  %1099 = vpow2.f32 %v946_v28  ;;  %v949_v54 = vmul.f32 -1.442695, %v1565_v10 }
  0xf3   :  { %v334_v33 = vpop.f32.mrf.mxu1  ;;  %v644_v7 = vmul.f32 %v612_v4, %v330_v25  ;;  %v613_v40 = vmul.f32 %v1080_v29, %v1500_v13  ;;  %1101 = vpow2.f32 %v952_v32  ;;  %v959_v29 = vmul.f32 -1.442695, %v1526_v31 }
  0xf4   :  { %v1082_v36 = vpop.eup %1081  ;;  %1103 = vpow2.f32 %v947_v35 }
  0xf5   :  { %v336_v43 = vpop.f32.mrf.mxu1  ;;  %v614_v46 = vmul.f32 %v1082_v36, %v1505_v16  ;;  %774 = vmatprep.mubr.f32.mxu0 %v644_v7  ;;  %1105 = vpow2.f32 %v953_v39  ;;  %v645_v57 = vmul.f32 %v613_v40, %v334_v33 }
  0xf6   :  { %v1084_v49 = vpop.eup %1083  ;;  %775 = vmatmul.mubr.f32.gmra.mxu0 %v643_v42  ;;  %1107 = vpow2.f32 %v948_v47 }
  0xf7   :  { %v340_v53 = vpop.f32.mrf.mxu1  ;;  %v646_v13 = vmul.f32 %v614_v46, %v336_v43  ;;  %v615_v16 = vmul.f32 %v1084_v49, %v1510_v19  ;;  %1109 = vpow2.f32 %v954_v50  ;;  %v957_v19 = vmul.f32 -1.442695, %v1517_v23 }
  0xf8   :  { %v1086_v55 = vpop.eup %1085  ;;  %1111 = vpow2.f32 %v949_v54  ;;  %v961_v43 = vmul.f32 -1.442695, %v1532_v38 }
  0xf9   :  { %v342_v58 = vpop.f32.mrf.mxu1  ;;  %v616_v59 = vmul.f32 %v1086_v55, %v1515_v22  ;;  %779 = vmatprep.mubr.f32.mxu0 %v646_v13  ;;  %v1088_v60 = vpop.eup %1087  ;;  %1113 = vpow2.f32 %v955_v56  ;;  %v647_v12 = vmul.f32 %v615_v16, %v340_v53  ;;  %v958_v53 = vmul.f32 -1.442695, %v1522_v27 }
  0xfa   :  { %780 = vmatmul.mubr.f32.gmra.mxu0 %v645_v57  ;;  %v1090_v0 = vpop.eup %1089  ;;  %v521_v3 = vadd.f32 1.0, %v1088_v60 }
  0xfb   :  { %v1575_v63 = vpop.f32.mrf.mxu1  ;;  %v648_v6 = vmul.f32 %v616_v59, %v342_v58  ;;  %v1092_v9 = vpop.eup %1091  ;;  %v529_v1 = vadd.f32 1.0, %v1090_v0  ;;  %v963_v59 = vmul.f32 -1.442695, %v1538_v45  ;;  %v960_v0 = vmul.f32 -1.442695, %v1528_v34 }
  0xfc   :  { %1115 = vrcp.f32 %v521_v3  ;;  %v522_v22 = vadd.f32 1.0, %v1092_v9  ;;  %v1094_v18 = vpop.eup %1093 }
  0xfd   :  { %v1578_v15 = vpop.f32.mrf.mxu1  ;;  %784 = vmatprep.mubr.f32.mxu0 %v648_v6  ;;  %1117 = vpow2.f32 %v956_v62  ;;  %v1096_v25 = vpop.eup %1095  ;;  %v523_v4 = vadd.f32 1.0, %v1094_v18 }
  0xfe   :  { %785 = vmatmul.mubr.f32.gmra.mxu0 %v647_v12  ;;  %1119 = vrcp.f32 %v522_v22  ;;  %v1098_v28 = vpop.eup %1097  ;;  %v530_v7 = vadd.f32 1.0, %v1096_v25 }
  0xff   :  { %v1580_v24 = vpop.f32.mrf.mxu1  ;;  %1121 = vpow2.f32 %v957_v19  ;;  %v524_v33 = vadd.f32 1.0, %v1098_v28  ;;  %v1100_v35 = vpop.eup %1099 }
 0x100   :  { %1123 = vrcp.f32 %v523_v4  ;;  %v1102_v39 = vpop.eup %1101  ;;  %v525_v40 = vadd.f32 1.0, %v1100_v35  ;;  %v965_v4 = vmul.f32 -1.442695, %v1544_v52 }
 0x101   :  { %v1583_v32 = vpop.f32.mrf.mxu1  ;;  %1125 = vrcp.f32 %v529_v1  ;;  %v1104_v42 = vpop.eup %1103  ;;  %v531_v9 = vadd.f32 1.0, %v1102_v39 }
 0x102   :  { %1127 = vrcp.f32 %v524_v33  ;;  %v1106_v47 = vpop.eup %1105  ;;  %v526_v49 = vadd.f32 1.0, %v1104_v42 }
 0x103   :  { %v1585_v36 = vpop.f32.mrf.mxu1  ;;  %1129 = vpow2.f32 %v959_v29  ;;  %v1108_v50 = vpop.eup %1107  ;;  %v532_v16 = vadd.f32 1.0, %v1106_v47  ;;  %v962_v29 = vmul.f32 -1.442695, %v1534_v41 }
 0x104   :  { %1131 = vrcp.f32 %v525_v40  ;;  %v1110_v13 = vpop.eup %1109  ;;  %v527_v55 = vadd.f32 1.0, %v1108_v50 }
 0x105   :  { %v1588_v46 = vpop.f32.mrf.mxu1  ;;  %1133 = vrcp.f32 %v530_v7  ;;  %v1112_v56 = vpop.eup %1111  ;;  %v533_v39 = vadd.f32 1.0, %v1110_v13 }
 0x106   :  { %1135 = vrcp.f32 %v526_v49  ;;  %v1114_v58 = vpop.eup %1113  ;;  %v528_v60 = vadd.f32 1.0, %v1112_v56 }
 0x107   :  { %v1591_v54 = vpop.f32.mrf.mxu1  ;;  %1137 = vpow2.f32 %v961_v43  ;;  %v534_v12 = vadd.f32 1.0, %v1114_v58 }
 0x108   :  { %1139 = vrcp.f32 %v527_v55 }
 0x109   :  { %v1593_v57 = vpop.f32.mrf.mxu1  ;;  %v1116_v62 = vpop.eup %1115  ;;  %1141 = vpow2.f32 %v958_v53  ;;  %v964_v53 = vmul.f32 -1.442695, %v1540_v48 }
 0x10a   :  { %v1118_v6 = vpop.eup %1117  ;;  %1143 = vrcp.f32 %v528_v60  ;;  %v617_v22 = vmul.f32 %v1116_v62, %v1520_v26 }
 0x10b   :  { %v1597_v3 = vpop.f32.mrf.mxu1  ;;  %v1120_v19 = vpop.eup %1119  ;;  %1145 = vrcp.f32 %v532_v16  ;;  %v535_v62 = vadd.f32 1.0, %v1118_v6 }
 0x10c   :  { %v1122_v1 = vpop.eup %1121  ;;  %v618_v25 = vmul.f32 %v1120_v19, %v1524_v30  ;;  %1147 = vpow2.f32 %v963_v59  ;;  %v649_v30 = vmul.f32 %v617_v22, %v1575_v63 }
 0x10d   :  { %v1600_v18 = vpop.f32.mrf.mxu1  ;;  %v1124_v28 = vpop.eup %1123  ;;  %1149 = vpow2.f32 %v960_v0  ;;  %v536_v47 = vadd.f32 1.0, %v1122_v1 }
 0x10e   :  { %v1607_v35 = vpop.eup %1125  ;;  %1151 = vrcp.f32 %v531_v9  ;;  %v650_v7 = vmul.f32 %v618_v25, %v1578_v15  ;;  %v619_v40 = vmul.f32 %v1124_v28, %v1530_v37 }
 0x10f   :  { %v1605_v33 = vpop.f32.mrf.mxu1  ;;  %v1128_v26 = vpop.eup %1127  ;;  %1153 = vrcp.f32 %v534_v12 }
 0x110   :  { %v1130_v43 = vpop.eup %1129  ;;  %v620_v49 = vmul.f32 %v1128_v26, %v1536_v44  ;;  %1155 = vpow2.f32 %v965_v4  ;;  %789 = vmatprep.mubr.f32.mxu0 %v650_v7  ;;  %v651_v56 = vmul.f32 %v619_v40, %v1580_v24 }
 0x111   :  { %v1612_v42 = vpop.f32.mrf.mxu1  ;;  %v1132_v50 = vpop.eup %1131  ;;  %1157 = vpow2.f32 %v962_v29  ;;  %790 = vmatmul.mubr.f32.gmra.mxu0 %v649_v30  ;;  %v538_v58 = vadd.f32 1.0, %v1130_v43  ;;  %v625_v30 = vmul.f32 %v1607_v35, %v1482_v2 }
 0x112   :  { %v1134_v13 = vpop.eup %1133  ;;  %v652_v37 = vmul.f32 %v620_v49, %v1583_v32  ;;  %1159 = vrcp.f32 %v533_v39  ;;  %v621_v63 = vmul.f32 %v1132_v50, %v1542_v51 }
 0x113   :  { %v1616_v15 = vpop.f32.mrf.mxu1  ;;  %v1136_v55 = vpop.eup %1135  ;;  %1161 = vrcp.f32 %v536_v47  ;;  %v626_v1 = vmul.f32 %v1134_v13, %v1487_v5 }
 0x114   :  { %v1138_v44 = vpop.eup %1137  ;;  %v622_v59 = vmul.f32 %v1136_v55, %v1550_v61  ;;  %794 = vmatprep.mubr.f32.mxu0 %v652_v37  ;;  %1163 = vpow2.f32 %v964_v53  ;;  %v653_v24 = vmul.f32 %v621_v63, %v1585_v36 }
 0x115   :  { %v384_v16 = vpop.f32.mrf.mxu1  ;;  %v1140_v60 = vpop.eup %1139  ;;  %795 = vmatmul.mubr.f32.gmra.mxu0 %v651_v56  ;;  %1165 = vrcp.f32 %v538_v58  ;;  %v540_v61 = vadd.f32 1.0, %v1138_v44  ;;  %v658_v36 = vmul.f32 %v626_v1, %v1600_v18 }
 0x116   :  { %v1142_v32 = vpop.eup %1141  ;;  %v654_v9 = vmul.f32 %v622_v59, %v1588_v46  ;;  %v623_v51 = vmul.f32 %v1140_v60, %v1557_v21  ;;  %1167 = vrcp.f32 %v535_v62 }
 0x117   :  { %v1622_v0 = vpop.f32.mrf.mxu1  ;;  %v1144_v19 = vpop.eup %1143  ;;  %v537_v4 = vadd.f32 1.0, %v1142_v32  ;;  %1169 = vrcp.f32 %v540_v61 }
 0x118   :  { %v1146_v22 = vpop.eup %1145  ;;  %v624_v6 = vmul.f32 %v1144_v19, %v1565_v10  ;;  %799 = vmatprep.mubr.f32.mxu0 %v654_v9  ;;  %v655_v7 = vmul.f32 %v623_v51, %v1591_v54  ;;  %v657_v54 = vmul.f32 %v625_v30, %v1597_v3 }
 0x119   :  { %v390_v12 = vpop.f32.mrf.mxu1  ;;  %v1148_v25 = vpop.eup %1147  ;;  %800 = vmatmul.mubr.f32.gmra.mxu0 %v653_v24  ;;  %v628_v39 = vmul.f32 %v1146_v22, %v1497_v11  ;;  %1171 = vrcp.f32 %v537_v4 }
 0x11a   :  { %v1150_v46 = vpop.eup %1149  ;;  %v656_v21 = vmul.f32 %v624_v6, %v1593_v57  ;;  %v542_v10 = vadd.f32 1.0, %v1148_v25 }
 0x11b   :  { %v1629_v28 = vpop.f32.mrf.mxu1  ;;  %v1152_v29 = vpop.eup %1151  ;;  %v539_v43 = vadd.f32 1.0, %v1150_v46  ;;  %v660_v18 = vmul.f32 %v628_v39, %v1612_v42 }
 0x11c   :  { %v1154_v26 = vpop.eup %1153  ;;  %804 = vmatprep.mubr.f32.mxu0 %v656_v21  ;;  %1173 = vrcp.f32 %v542_v10  ;;  %v627_v13 = vmul.f32 %v1152_v29, %v1492_v8 }
 0x11d   :  { %v396_v5 = vpop.f32.mrf.mxu1  ;;  %v1156_v40 = vpop.eup %1155  ;;  %805 = vmatmul.mubr.f32.gmra.mxu0 %v655_v7  ;;  %v630_v11 = vmul.f32 %v1154_v26, %v1507_v17  ;;  %1175 = vrcp.f32 %v539_v43 }
 0x11e   :  { %v1158_v57 = vpop.eup %1157  ;;  %809 = vmatprep.mubr.f32.mxu0 %v658_v36  ;;  %v544_v50 = vadd.f32 1.0, %v1156_v40  ;;  %v659_v55 = vmul.f32 %v627_v13, %v1605_v33 }
 0x11f   :  { %v400_v47 = vpop.f32.mrf.mxu1  ;;  %v1160_v49 = vpop.eup %1159  ;;  %v541_v2 = vadd.f32 1.0, %v1158_v57  ;;  %v662_v37 = vmul.f32 %v630_v11, %v384_v16 }
 0x120   :  { %v1162_v53 = vpop.eup %1161  ;;  %1177 = vrcp.f32 %v544_v50  ;;  %v629_v17 = vmul.f32 %v1160_v49, %v1502_v14 }
 0x121   :  { %810 = vmatmul.mubr.f32.gmra.mxu0 %v657_v54  ;;  %v1164_v35 = vpop.eup %1163  ;;  %v402_v42 = vpop.f32.mrf.mxu1  ;;  %v632_v3 = vmul.f32 %v1162_v53, %v1517_v23  ;;  %1179 = vrcp.f32 %v541_v2 }
 0x122   :  { %814 = vmatprep.mubr.f32.mxu0 %v660_v18  ;;  %v1166_v63 = vpop.eup %1165  ;;  %v543_v56 = vadd.f32 1.0, %v1164_v35  ;;  %v661_v58 = vmul.f32 %v629_v17, %v1616_v15 }
 0x123   :  { %v1168_v44 = vpop.eup %1167  ;;  %v664_v8 = vmul.f32 %v632_v3, %v390_v12  ;;  %v406_v59 = vpop.f32.mrf.mxu1  ;;  %v634_v16 = vmul.f32 %v1166_v63, %v1526_v31 }
 0x124   :  { %v1170_v60 = vpop.eup %1169  ;;  %v631_v33 = vmul.f32 %v1168_v44, %v1512_v20  ;;  %1181 = vrcp.f32 %v543_v56 }
 0x125   :  { %815 = vmatmul.mubr.f32.gmra.mxu0 %v659_v55  ;;  %v666_v62 = vmul.f32 %v634_v16, %v396_v5  ;;  %v408_v32 = vpop.f32.mrf.mxu1  ;;  %v636_v9 = vmul.f32 %v1170_v60, %v1532_v38 }
 0x126   :  { %819 = vmatprep.mubr.f32.mxu0 %v662_v37  ;;  %v1172_v23 = vpop.eup %1171  ;;  %v663_v14 = vmul.f32 %v631_v33, %v1622_v0 }
 0x127   :  { %v633_v51 = vmul.f32 %v1172_v23, %v1522_v27  ;;  %v668_v31 = vmul.f32 %v636_v9, %v402_v42  ;;  %v412_v20 = vpop.f32.mrf.mxu1 }
 0x129   :  { %820 = vmatmul.mubr.f32.gmra.mxu0 %v661_v58  ;;  %v1174_v19 = vpop.eup %1173  ;;  %v665_v24 = vmul.f32 %v633_v51, %v1629_v28  ;;  %v414_v6 = vpop.f32.mrf.mxu1 }
 0x12a   :  { %824 = vmatprep.mubr.f32.mxu0 %v664_v8  ;;  %v1176_v15 = vpop.eup %1175  ;;  %v638_v12 = vmul.f32 %v1174_v19, %v1538_v45 }
 0x12b   :  { %v635_v1 = vmul.f32 %v1176_v15, %v1528_v34 }
 0x12c   :  { %v670_v61 = vmul.f32 %v638_v12, %v408_v32 }
 0x12d   :  { %825 = vmatmul.mubr.f32.gmra.mxu0 %v663_v14  ;;  %v1178_v22 = vpop.eup %1177  ;;  %v667_v38 = vmul.f32 %v635_v1, %v400_v47 }
 0x12e   :  { %829 = vmatprep.mubr.f32.mxu0 %v666_v62  ;;  %v1180_v0 = vpop.eup %1179  ;;  %v640_v27 = vmul.f32 %v1178_v22, %v1544_v52 }
 0x12f   :  { %v637_v25 = vmul.f32 %v1180_v0, %v1534_v41 }
 0x130   :  { %v672_v28 = vmul.f32 %v640_v27, %v414_v6 }
 0x131   :  { %830 = vmatmul.mubr.f32.gmra.mxu0 %v665_v24  ;;  %v1182_v4 = vpop.eup %1181  ;;  %v669_v46 = vmul.f32 %v637_v25, %v406_v59 }
 0x132   :  { %834 = vmatprep.mubr.f32.mxu0 %v668_v31  ;;  %v639_v45 = vmul.f32 %v1182_v4, %v1540_v48 }
 0x134   :  { %v671_v34 = vmul.f32 %v639_v45, %v412_v20 }
 0x135   :  { %835 = vmatmul.mubr.f32.gmra.mxu0 %v667_v38 }
 0x136   :  { %839 = vmatprep.mubr.f32.mxu0 %v670_v61 }
 0x139   :  { %840 = vmatmul.mubr.f32.gmra.mxu0 %v669_v46 }
 0x13a   :  { %844 = vmatprep.mubr.f32.mxu0 %v672_v28 }
 0x13d   :  { %845 = vmatmul.mubr.f32.gmra.mxu0 %v671_v34 }
 0x1b2   :  { %v998_v21 = vpop.f32.mrf.mxu0 }
 0x1b4   :  { %v999_v36 = vpop.f32.mrf.mxu0 }
 0x1b5   :  { %v1000_v29 = vadd.f32 %v999_v36, %v998_v21 }
 0x1b6   :  { %v1001_v7 = vpop.f32.mrf.mxu0 }
 0x1b7   :  { %850 = vst.msk [vmem:[#allocation2] sm:$0xff] %vm46_vm0, %v1000_v29 }
 0x1b8   :  { %v1002_v52 = vpop.f32.mrf.mxu0 }
 0x1b9   :  { %v1003_v5 = vadd.f32 %v1002_v52, %v1001_v7 }
 0x1ba   :  { %v1004_v41 = vpop.f32.mrf.mxu0 }
 0x1bb   :  { %851 = vst.msk [vmem:[#allocation2 + $0x8] sm:$0xff] %vm46_vm0, %v1003_v5 }
 0x1bc   :  { %v1005_v26 = vpop.f32.mrf.mxu0 }
 0x1bd   :  { %v1006_v39 = vadd.f32 %v1005_v26, %v1004_v41 }
 0x1be   :  { %v866_v10 = vld [vmem:[#allocation2] sm:$0xff]  ;;  %v1007_v40 = vpop.f32.mrf.mxu0 }
 0x1bf   :  { %882 = vst.msk [vmem:[%s1739_s3] sm:$0xff] %vm46_vm0, %v866_v10  ;;  %852 = vst.msk [vmem:[#allocation2 + $0x10] sm:$0xff] %vm46_vm0, %v1006_v39 }
 0x1c0   :  { %v1008_v48 = vpop.f32.mrf.mxu0 }
 0x1c1   :  { %v1009_v30 = vadd.f32 %v1008_v48, %v1007_v40 }
 0x1c2   :  { %v867_v43 = vld [vmem:[#allocation2 + $0x8] sm:$0xff] }
 0x1c3   :  { %883 = vst.msk [vmem:[%s1739_s3 + $0x8] sm:$0xff] %vm46_vm0, %v867_v43  ;;  %853 = vst.msk [vmem:[#allocation2 + $0x18] sm:$0xff] %vm46_vm0, %v1009_v30 }
 0x1c6   :  { %v868_v57 = vld [vmem:[#allocation2 + $0x10] sm:$0xff] }
 0x1c7   :  { %884 = vst.msk [vmem:[%s1739_s3 + $0x10] sm:$0xff] %vm46_vm0, %v868_v57 }
 0x1ca   :  { %v869_v18 = vld [vmem:[#allocation2 + $0x18] sm:$0xff] }
 0x1cb   :  { %885 = vst.msk [vmem:[%s1739_s3 + $0x18] sm:$0xff] %vm46_vm0, %v869_v18 }
 0x1d1   :  { %v1010_v54 = vpop.f32.mrf.mxu0 }
 0x1d3   :  { %v1011_v47 = vpop.f32.mrf.mxu0 }
 0x1d4   :  { %v1012_v49 = vadd.f32 %v1011_v47, %v1010_v54 }
 0x1d5   :  { %v1013_v11 = vpop.f32.mrf.mxu0 }
 0x1d6   :  { %854 = vst.msk [vmem:[#allocation2 + $0x20] sm:$0xff] %vm46_vm0, %v1012_v49 }
 0x1d7   :  { %v1014_v50 = vpop.f32.mrf.mxu0 }
 0x1d8   :  { %v1015_v53 = vadd.f32 %v1014_v50, %v1013_v11 }
 0x1d9   :  { %v1016_v13 = vpop.f32.mrf.mxu0 }
 0x1da   :  { %855 = vst.msk [vmem:[#allocation2 + $0x28] sm:$0xff] %vm46_vm0, %v1015_v53 }
 0x1db   :  { %v1017_v2 = vpop.f32.mrf.mxu0 }
 0x1dc   :  { %v1018_v35 = vadd.f32 %v1017_v2, %v1016_v13 }
 0x1dd   :  { %v870_v37 = vld [vmem:[#allocation2 + $0x20] sm:$0xff]  ;;  %v1019_v55 = vpop.f32.mrf.mxu0 }
 0x1de   :  { %886 = vst.msk [vmem:[%s1739_s3 + $0x20] sm:$0xff] %vm46_vm0, %v870_v37  ;;  %856 = vst.msk [vmem:[#allocation2 + $0x30] sm:$0xff] %vm46_vm0, %v1018_v35 }
 0x1df   :  { %v1020_v42 = vpop.f32.mrf.mxu0 }
 0x1e0   :  { %v1021_v3 = vadd.f32 %v1020_v42, %v1019_v55 }
 0x1e1   :  { %v871_v63 = vld [vmem:[#allocation2 + $0x28] sm:$0xff]  ;;  %v1022_v17 = vpop.f32.mrf.mxu0 }
 0x1e2   :  { %887 = vst.msk [vmem:[%s1739_s3 + $0x28] sm:$0xff] %vm46_vm0, %v871_v63  ;;  %857 = vst.msk [vmem:[#allocation2 + $0x38] sm:$0xff] %vm46_vm0, %v1021_v3 }
 0x1e3   :  { %v1023_v56 = vpop.f32.mrf.mxu0 }
 0x1e4   :  { %v1024_v44 = vadd.f32 %v1023_v56, %v1022_v17 }
 0x1e5   :  { %v872_v8 = vld [vmem:[#allocation2 + $0x30] sm:$0xff]  ;;  %v1025_v58 = vpop.f32.mrf.mxu0 }
 0x1e6   :  { %888 = vst.msk [vmem:[%s1739_s3 + $0x30] sm:$0xff] %vm46_vm0, %v872_v8  ;;  %858 = vst.msk [vmem:[#allocation2 + $0x40] sm:$0xff] %vm46_vm0, %v1024_v44 }
 0x1e7   :  { %v1026_v59 = vpop.f32.mrf.mxu0 }
 0x1e8   :  { %v1027_v16 = vadd.f32 %v1026_v59, %v1025_v58 }
 0x1e9   :  { %v873_v60 = vld [vmem:[#allocation2 + $0x38] sm:$0xff]  ;;  %v1028_v33 = vpop.f32.mrf.mxu0 }
 0x1ea   :  { %889 = vst.msk [vmem:[%s1739_s3 + $0x38] sm:$0xff] %vm46_vm0, %v873_v60  ;;  %859 = vst.msk [vmem:[#allocation2 + $0x48] sm:$0xff] %vm46_vm0, %v1027_v16 }
 0x1eb   :  { %v1029_v23 = vpop.f32.mrf.mxu0 }
 0x1ec   :  { %v1030_v62 = vadd.f32 %v1029_v23, %v1028_v33 }
 0x1ed   :  { %v874_v14 = vld [vmem:[#allocation2 + $0x40] sm:$0xff]  ;;  %v1031_v32 = vpop.f32.mrf.mxu0 }
 0x1ee   :  { %890 = vst.msk [vmem:[%s1739_s3 + $0x40] sm:$0xff] %vm46_vm0, %v874_v14  ;;  %860 = vst.msk [vmem:[#allocation2 + $0x50] sm:$0xff] %vm46_vm0, %v1030_v62 }
 0x1ef   :  { %v1032_v9 = vpop.f32.mrf.mxu0 }
 0x1f0   :  { %v1033_v19 = vadd.f32 %v1032_v9, %v1031_v32 }
 0x1f1   :  { %v875_v51 = vld [vmem:[#allocation2 + $0x48] sm:$0xff]  ;;  %v1034_v15 = vpop.f32.mrf.mxu0 }
 0x1f2   :  { %891 = vst.msk [vmem:[%s1739_s3 + $0x48] sm:$0xff] %vm46_vm0, %v875_v51  ;;  %861 = vst.msk [vmem:[#allocation2 + $0x58] sm:$0xff] %vm46_vm0, %v1033_v19 }
 0x1f3   :  { %v1035_v31 = vpop.f32.mrf.mxu0 }
 0x1f4   :  { %v1036_v24 = vadd.f32 %v1035_v31, %v1034_v15 }
 0x1f5   :  { %v876_v20 = vld [vmem:[#allocation2 + $0x50] sm:$0xff]  ;;  %v1037_v12 = vpop.f32.mrf.mxu0 }
 0x1f6   :  { %892 = vst.msk [vmem:[%s1739_s3 + $0x50] sm:$0xff] %vm46_vm0, %v876_v20  ;;  %862 = vst.msk [vmem:[#allocation2 + $0x60] sm:$0xff] %vm46_vm0, %v1036_v24 }
 0x1f7   :  { %v1038_v22 = vpop.f32.mrf.mxu0 }
 0x1f8   :  { %v1039_v1 = vadd.f32 %v1038_v22, %v1037_v12 }
 0x1f9   :  { %v877_v0 = vld [vmem:[#allocation2 + $0x58] sm:$0xff]  ;;  %v1040_v61 = vpop.f32.mrf.mxu0 }
 0x1fa   :  { %893 = vst.msk [vmem:[%s1739_s3 + $0x58] sm:$0xff] %vm46_vm0, %v877_v0  ;;  %863 = vst.msk [vmem:[#allocation2 + $0x68] sm:$0xff] %vm46_vm0, %v1039_v1 }
 0x1fb   :  { %v1041_v38 = vpop.f32.mrf.mxu0 }
 0x1fc   :  { %v1042_v6 = vadd.f32 %v1041_v38, %v1040_v61 }
 0x1fd   :  { %v878_v27 = vld [vmem:[#allocation2 + $0x60] sm:$0xff]  ;;  %v1043_v25 = vpop.f32.mrf.mxu0 }
 0x1fe   :  { %894 = vst.msk [vmem:[%s1739_s3 + $0x60] sm:$0xff] %vm46_vm0, %v878_v27  ;;  %864 = vst.msk [vmem:[#allocation2 + $0x70] sm:$0xff] %vm46_vm0, %v1042_v6 }
 0x1ff   :  { %v1044_v4 = vpop.f32.mrf.mxu0 }
 0x200   :  { %v1045_v28 = vadd.f32 %v1044_v4, %v1043_v25 }
 0x201   :  { %v879_v46 = vld [vmem:[#allocation2 + $0x68] sm:$0xff] }
 0x202   :  { %895 = vst.msk [vmem:[%s1739_s3 + $0x68] sm:$0xff] %vm46_vm0, %v879_v46  ;;  %865 = vst.msk [vmem:[#allocation2 + $0x78] sm:$0xff] %vm46_vm0, %v1045_v28 }
 0x205   :  { %v880_v45 = vld [vmem:[#allocation2 + $0x70] sm:$0xff] }
 0x206   :  { %896 = vst.msk [vmem:[%s1739_s3 + $0x70] sm:$0xff] %vm46_vm0, %v880_v45 }
 0x209   :  { %v881_v34 = vld [vmem:[#allocation2 + $0x78] sm:$0xff] }
 0x20a   :  { %897 = vst.msk [vmem:[%s1739_s3 + $0x78] sm:$0xff] %vm46_vm0, %v881_v34 }

</bundles_post_ra>
